<compile_context>
chip_gen: v6e
topology: v6e:2x2x1
jax: 0.10.0
libtpu: 0.0.40
codegen_flags: <defaults>
</compile_context>

<pallas_src>
import functools

import jax
import jax.numpy as jnp
from jax import lax
from jax.experimental import pallas as pl
from jax.experimental.pallas import tpu as pltpu

EPS = 1e-07
LANE = 128
SUB = 8
MAX_BLOCK_ROWS = 1024  # 1024x128 f32 = 512 KiB per stream per step


def _gan_loss_kernel(*refs, loss_type, has_real, n_valid, block_rows, num_blocks):
    if has_real:
        fake_ref, real_ref, out_ref = refs
    else:
        fake_ref, out_ref = refs
        real_ref = None

    i = pl.program_id(0)
    fake = fake_ref[...].astype(jnp.float32)

    if not has_real:
        if loss_type == "non_saturating":
            # per-element: -log(sigmoid(fake) + EPS)
            contrib = -jnp.log(jax.nn.sigmoid(fake) + EPS)
        elif loss_type == "hinge":
            # per-element: -fake
            contrib = -fake
        else:
            raise ValueError(loss_type)
    else:
        real = real_ref[...].astype(jnp.float32)
        if loss_type == "non_saturating":
            contrib = (-jnp.log(jax.nn.sigmoid(real) + EPS)
                       - jnp.log(1.0 - jax.nn.sigmoid(fake) + EPS))
        elif loss_type == "hinge":
            contrib = (-jnp.minimum(0.0, real - 1.0)
                       - jnp.minimum(0.0, -fake - 1.0))
        else:
            raise ValueError(loss_type)

    def _write(c):
        # (block_rows, 128) -> (8, 128) partial sum: pure VPU vreg adds (no XLU,
        # no scalar chain).  Final cross-lane reduce happens once in the wrapper.
        out_ref[...] = c.reshape(block_rows // SUB, SUB, LANE).sum(axis=0)

    block_elems = block_rows * LANE
    padded_total = num_blocks * block_elems
    if padded_total == n_valid:
        # Static: no padding anywhere -> no mask work at all.
        _write(contrib)
    else:
        # Padding only exists in the last block; mask it there only.
        last = num_blocks - 1                         # python int
        tail_valid = n_valid - last * block_elems     # python int

        @pl.when(i != last)
        def _():
            _write(contrib)

        @pl.when(i == last)
        def _():
            lidx = (lax.broadcasted_iota(jnp.int32, contrib.shape, 0) * LANE
                    + lax.broadcasted_iota(jnp.int32, contrib.shape, 1))
            _write(jnp.where(lidx < tail_valid, contrib, 0.0))


def _round_up(x, m):
    return ((x + m - 1) // m) * m


def _prepare(x):
    """Flatten scores (any shape, native dtype) to a lane-dense [rows, 128] slab."""
    flat = x.reshape(-1)
    n = flat.shape[0]
    rows_needed = (n + LANE - 1) // LANE
    block_rows = min(MAX_BLOCK_ROWS, _round_up(rows_needed, SUB))
    num_blocks = (rows_needed + block_rows - 1) // block_rows
    rows_padded = num_blocks * block_rows
    padded_total = rows_padded * LANE
    if padded_total != n:
        flat = jnp.pad(flat, (0, padded_total - n))   # pad value masked in-kernel
    return flat.reshape(rows_padded, LANE), n, block_rows, num_blocks


def gan_loss(loss_type, fake_scores, real_scores=None):
    """Pallas implementation of GANLoss.forward."""
    has_real = real_scores is not None
    fake2d, n, block_rows, num_blocks = _prepare(fake_scores)

    inputs = [fake2d]
    if has_real:
        real2d, n_r, _, _ = _prepare(real_scores)
        assert real2d.shape == fake2d.shape and n_r == n, \
            "fake/real scores assumed to share a shape (as in the usual GAN setup)"
        inputs.append(real2d)

    blk = pl.BlockSpec((block_rows, LANE), lambda i: (i, 0))
    kernel = functools.partial(
        _gan_loss_kernel, loss_type=loss_type, has_real=has_real,
        n_valid=n, block_rows=block_rows, num_blocks=num_blocks)

    partials = pl.pallas_call(
        kernel,
        out_shape=jax.ShapeDtypeStruct((num_blocks * SUB, LANE), jnp.float32),
        grid_spec=pltpu.PrefetchScalarGridSpec(
            num_scalar_prefetch=0,
            grid=(num_blocks,),
            in_specs=[blk] * len(inputs),
            out_specs=pl.BlockSpec((SUB, LANE), lambda i: (i, 0)),
        ),
        compiler_params=pltpu.CompilerParams(
            dimension_semantics=("parallel",)),   # independent partial sums per block
    )(*inputs)

    # One tiny final reduction over (num_blocks*8, 128) partial sums.
    return jnp.sum(partials) / jnp.float32(n)


def _ref_loss(loss_type, fake, real=None):
    """Pure-JAX reference mirroring the PyTorch module."""
    if real is None:
        if loss_type == "non_saturating":
            return -jnp.mean(jnp.log(jax.nn.sigmoid(fake) + EPS))
        return -jnp.mean(fake)
    if loss_type == "non_saturating":
        return (-jnp.mean(jnp.log(jax.nn.sigmoid(real) + EPS))
                - jnp.mean(jnp.log(1.0 - jax.nn.sigmoid(fake) + EPS)))
    return (-jnp.mean(jnp.minimum(0.0, real - 1.0))
            - jnp.mean(jnp.minimum(0.0, -fake - 1.0)))


if __name__ == "__main__":
    key = jax.random.PRNGKey(0)
    kf, kr = jax.random.split(key)
    # NCHW discriminator score maps (small, deterministic)
    fake_scores = jax.random.normal(kf, (2, 1, 32, 32), dtype=jnp.float32)
    real_scores = jax.random.normal(kr, (2, 1, 32, 32), dtype=jnp.float32)

    cases = [
        ("non_saturating", fake_scores, None),          # generator loss
        ("hinge",          fake_scores, None),          # generator loss
        ("non_saturating", fake_scores, real_scores),   # discriminator loss
        ("hinge",          fake_scores, real_scores),   # discriminator loss
    ]

    for loss_type, f, r in cases:
        got = jax.block_until_ready(gan_loss(loss_type, f, r))
        want = _ref_loss(loss_type, f, r)
        assert jnp.allclose(got, want, rtol=1e-5, atol=1e-6), \
            f"{loss_type} (real={r is not None}): {got} vs {want}"

    print("KERNEL_OK")
</pallas_src>

<mosaic_0001>
module attributes {stable_mosaic.version = 11 : i64} {
  func.func @_gan_loss_kernel(%arg0: i32, %arg1: memref<16x128xf32, #tpu.memory_space<vmem>>, %arg2: memref<8x128xf32, #tpu.memory_space<vmem>>) attributes {dimension_semantics = [#tpu.dimension_semantics<parallel>], iteration_bounds = array<i64: 1>, scalar_prefetch = 0 : i64, scratch_operands = 0 : i64, tpu.core_type = #tpu.core_type<tc>, window_params = [{transform_indices = @transform_0, window_bounds = array<i64: 16, 128>}, {transform_indices = @transform_1, window_bounds = array<i64: 8, 128>}]} {
    %c0 = arith.constant 0 : index
    %c0_0 = arith.constant 0 : index
    %0 = vector.load %arg1[%c0, %c0_0] : memref<16x128xf32, #tpu.memory_space<vmem>>, vector<16x128xf32>
    %1 = arith.negf %0 : vector<16x128xf32>
    %2 = math.exp %1 : vector<16x128xf32>
    %cst = arith.constant 1.000000e+00 : f32
    %3 = vector.broadcast %cst : f32 to vector<16x128xf32>
    %4 = arith.addf %3, %2 : vector<16x128xf32>
    %5 = arith.divf %3, %4 : vector<16x128xf32>
    %cst_1 = arith.constant 1.000000e-07 : f32
    %6 = vector.broadcast %cst_1 : f32 to vector<16x128xf32>
    %7 = arith.addf %5, %6 : vector<16x128xf32>
    %8 = math.log %7 : vector<16x128xf32>
    %cst_2 = arith.constant 0.000000e+00 : f32
    %9 = vector.broadcast %cst_2 : f32 to vector<16x128xf32>
    %10 = arith.subf %9, %8 : vector<16x128xf32>
    %11 = vector.shape_cast %10 : vector<16x128xf32> to vector<2x8x128xf32>
    %cst_3 = arith.constant dense<0.000000e+00> : vector<8x128xf32>
    %12 = vector.multi_reduction <add>, %11, %cst_3 [0] : vector<2x8x128xf32> to vector<8x128xf32>
    %c0_4 = arith.constant 0 : index
    %c0_5 = arith.constant 0 : index
    %13 = vector.load %arg2[%c0_4, %c0_5] : memref<8x128xf32, #tpu.memory_space<vmem>>, vector<8x128xf32>
    tpu.vector_store %arg2[%c0_4, %c0_5], %12 {strides = array<i32>} : memref<8x128xf32, #tpu.memory_space<vmem>>, vector<8x128xf32>,
    return
  }
  func.func @transform_0(%arg0: i32) -> (i32, i32) {
    %c0_i32 = arith.constant 0 : i32
    %c0_i32_0 = arith.constant 0 : i32
    return %arg0, %c0_i32 : i32, i32
  }
  func.func @transform_1(%arg0: i32) -> (i32, i32) {
    %c0_i32 = arith.constant 0 : i32
    %c0_i32_0 = arith.constant 0 : i32
    return %arg0, %c0_i32 : i32, i32
  }
}

</mosaic_0001>

<bundles_post_ra>
// kernel: tpu_custom_call.1
= control target key start
LH: loop header
LB: loop body
LE: loop exit
PB: predicated region body
PF: predicated region fallthrough
CT: control target
= control target key end

     0   :  { %6 = vsyncpa [#allocation3], 0  ;;  %s144_s0 = inlined_call_operand.hbm [shape: f32[16,128], index: 0, kind: input, shape index: {}]   ;;  %s145_s1 = inlined_call_operand.hbm [shape: f32[8,128], index: 1, kind: output, shape index: {}]  }
   0x1   :  { %7 = vsyncpa [#allocation4], 0  ;;  %s124_s6 = smov [#allocation2]  }
   0x2   :  { %s13_s7 = sshll.u32 %s124_s6, 4  ;;  %s14_s7 = int_to_ptr.vmem [resolvable:$true] %s13_s7 }
   0x3   :  { %s88_s8 = scalar_lea.vmem %s14_s7, 256  ;;  %p93_p1 = scmp.lt.s32.totalorder %s14_s7, %s14_s7 }
   0x4   :  { %p89_p0 = scmp.ne.s32.totalorder %s14_s7, %s88_s8  ;;  %p94_p2 = scmp.lt.s32.totalorder %s88_s8, %s88_s8 }
   0x6   :  { %p95_p3 = por %p94_p2, %p93_p1 }
   0x8   :  { %p96_p4 = pnand %p95_p3, %p89_p0 }
   0xa   :  { %99 = shalt.err (!%p96_p4)
}
   0xb   :  { %s125_s9 = smov 128   ;;  %s126_s10 = smov 8  }
   0xc   :  { %19 = dma.hbm_to_vmem [thread:$0]  %s144_s0, 256, %s14_s7, [#allocation3], %s125_s9, %s125_s9, %s126_s10  }
   0xd   :  { %120 = dma.done.wait [#allocation3], 256  }
   0xe   :  { %121 = vsyncadd [#allocation3], 4294967040  ;;  %v23_v0 = vld [vmem:[#allocation2] sm:$0xff]  ;;  %v24_v1 = vld [vmem:[#allocation2 + $0x8] sm:$0xff]  ;;  %s127_s0 = smov [#allocation5]  }
   0xf   :  { %v62_v2 = vmul.f32 -1.442695, %v23_v0  ;;  %v63_v3 = vmul.f32 -1.442695, %v24_v1  ;;  %s53_s13 = sshll.u32 %s127_s0, 4  ;;  %s54_s13 = int_to_ptr.vmem [resolvable:$true] %s53_s13 }
  0x10   :  { %s100_s14 = scalar_lea.vmem %s54_s13, 128  ;;  %p105_p6 = scmp.lt.s32.totalorder %s54_s13, %s54_s13 }
  0x11   :  { %68 = vpow2.f32 %v62_v2  ;;  %p101_p5 = scmp.ne.s32.totalorder %s54_s13, %s100_s14  ;;  %p106_p7 = scmp.lt.s32.totalorder %s100_s14, %s100_s14 }
  0x12   :  { %70 = vpow2.f32 %v63_v3 }
  0x13   :  { %p107_p8 = por %p106_p7, %p105_p6 }
  0x15   :  { %p108_p9 = pnand %p107_p8, %p101_p5 }
  0x1e   :  { %v69_v4 = vpop.eup %68 }
  0x1f   :  { %v71_v5 = vpop.eup %70  ;;  %v31_v6 = vadd.f32 1.0, %v69_v4 }
  0x20   :  { %v32_v7 = vadd.f32 1.0, %v71_v5 }
  0x21   :  { %72 = vrcp.f32 %v31_v6 }
  0x22   :  { %74 = vrcp.f32 %v32_v7 }
  0x2e   :  { %v73_v8 = vpop.eup %72 }
  0x2f   :  { %v75_v9 = vpop.eup %74  ;;  %v37_v10 = vadd.f32 1e-07, %v73_v8 }
  0x30   :  { %v38_v11 = vadd.f32 1e-07, %v75_v9 }
  0x31   :  { %76 = vlog2.f32 %v37_v10 }
  0x32   :  { %78 = vlog2.f32 %v38_v11 }
  0x3e   :  { %v77_v12 = vpop.eup %76 }
  0x3f   :  { %v79_v13 = vpop.eup %78  ;;  %v40_v14 = vmul.f32 0.6931472, %v77_v12 }
  0x40   :  { %v42_v15 = vmul.f32 0.6931472, %v79_v13 }
  0x41   :  { %v43_v16 = vsub.f32 0.0, %v40_v14 }
  0x42   :  { %v44_v17 = vsub.f32 0.0, %v42_v15 }
  0x44   :  { %v45_v18 = vadd.f32 %v44_v17, %v43_v16 }
  0x46   :  { %46 = vst [vmem:[#allocation5] sm:$0xff] %v45_v18 }
  0x47   :  { %111 = shalt.err (!%p108_p9)
}
  0x48   :  { %56 = dma.vmem_to_hbm [thread:$0]  %s54_s13, 128, %s145_s1, [#allocation4]  }
  0x49   :  { %122 = dma.done.wait [#allocation4], 128  }
  0x4a   :  { %123 = vsyncadd [#allocation4], 4294967168 }
  0x4b   :  { %60 = vsyncpa [#allocation3], 1 }
  0x4c   :  { %61 = vsyncpa [#allocation4], 1 }

</bundles_post_ra>
